<compile_context>
chip_gen: v7x
topology: tpu7x:2x2x1
jax: 0.10.0
libtpu: 0.0.40
codegen_flags: <defaults>
</compile_context>

<pallas_src>
import jax
import jax.numpy as jnp
from jax.experimental import pallas as pl
from jax.experimental.pallas import tpu as pltpu

# SELU constants (match torch.nn.SELU)
_SELU_ALPHA = 1.6732632423543772
_SELU_SCALE = 1.0507009873554805


def _selu(x):
    return _SELU_SCALE * jnp.where(x > 0, x, _SELU_ALPHA * jnp.expm1(x))


def critic_kernel(idx_ref, table_ref, out_ref):
    """One batch tile per grid step.

    idx_ref   : (block_b, 1) int32 state indices (VMEM)
    table_ref : (k_pad, n_pad) precomputed full-network lookup table (VMEM)
    out_ref   : (block_b, n_pad) float32 output tile
    """
    block_b = out_ref.shape[0]
    k_pad = table_ref.shape[0]

    idx = idx_ref[...]  # (block_b, 1) int32
    col_iota = jax.lax.broadcasted_iota(jnp.int32, (block_b, k_pad), 1)
    onehot = (col_iota == idx).astype(jnp.float32)  # single vector compare

    # Single MXU push: one-hot gather of the folded network table.
    out_ref[...] = jnp.dot(
        onehot, table_ref[...], preferred_element_type=jnp.float32
    )


def critic_forward(idx, emb, w1, b1, w2, b2, w3, b3, *, block_b=None):
    """idx: (B, 1) int32 state indices. Returns (B, action_dim) float32."""
    B = idx.shape[0]
    action_dim = w3.shape[1]
    max_states = emb.shape[0]

    # ---- wrapper-side preprocessing (once, outside the kernel) ----
    # Fold the whole network into a (max_states, action_dim) table.
    h = _selu(jnp.dot(emb, w1, preferred_element_type=jnp.float32) + b1)
    h = _selu(jnp.dot(h, w2, preferred_element_type=jnp.float32) + b2)
    table = jnp.dot(h, w3, preferred_element_type=jnp.float32) + b3

    # Pad to 128-aligned contraction / lane-dense output columns.
    k_pad = 128 * pl.cdiv(max_states, 128)
    n_pad = 128 * pl.cdiv(action_dim, 128)
    table_p = jnp.pad(
        table, ((0, k_pad - max_states), (0, n_pad - action_dim))
    ).astype(jnp.float32)

    # Choose the batch tile: multiple of 8, capped at 256 (MXU row dim on
    # v6e/v7x); for large batches prefer >=2 grid blocks so v7x's second
    # TensorCore gets work.
    b_round = 8 * pl.cdiv(B, 8)
    if block_b is None:
        block_b = min(256, b_round)
        if b_round > block_b or (b_round >= 16 and b_round // block_b < 2):
            block_b = min(block_b, max(8, 8 * pl.cdiv(pl.cdiv(b_round, 2), 8)))
    block_b = max(8, 8 * pl.cdiv(block_b, 8))

    num_blocks = pl.cdiv(B, block_b)
    b_pad = num_blocks * block_b

    # Indices as a (b_pad, 1) int32 VMEM input (padded rows map past
    # max_states -> zero one-hot -> zero output row; sliced off below).
    idx_flat = idx.reshape(-1).astype(jnp.int32)
    if b_pad != B:
        idx_flat = jnp.pad(idx_flat, (0, b_pad - B), constant_values=max_states)
    idx_2d = idx_flat.reshape(b_pad, 1)

    out = pl.pallas_call(
        critic_kernel,
        out_shape=jax.ShapeDtypeStruct((b_pad, n_pad), jnp.float32),
        grid=(num_blocks,),
        in_specs=[
            pl.BlockSpec((block_b, 1), lambda i: (i, 0)),
            pl.BlockSpec((k_pad, n_pad), lambda i: (0, 0)),
        ],
        out_specs=pl.BlockSpec((block_b, n_pad), lambda i: (i, 0)),
        compiler_params=pltpu.CompilerParams(
            dimension_semantics=("parallel",),  # splits batch across TCs on v7x
        ),
    )(idx_2d, table_p)

    return out[:B, :action_dim]


def _ref_forward(idx, emb, w1, b1, w2, b2, w3, b3):
    x = emb[idx[:, 0]]  # (B, E)  == Embedding(x).squeeze(-2)
    h = _selu(x @ w1 + b1)
    h = _selu(h @ w2 + b2)
    return h @ w3 + b3


if __name__ == "__main__":
    # Module hyperparameters (small, consistent with Critic.__init__)
    action_dim = 4
    hidden_dim = 32
    max_states = 100
    embed_dim = 1
    B = 8

    key = jax.random.PRNGKey(0)
    k = jax.random.split(key, 8)

    # Deterministic synthetic parameters
    emb = jax.random.normal(k[0], (max_states, embed_dim), jnp.float32)
    w1 = jax.random.normal(k[1], (embed_dim, hidden_dim), jnp.float32) * 0.5
    b1 = jax.random.normal(k[2], (1, hidden_dim), jnp.float32) * 0.1
    w2 = jax.random.normal(k[3], (hidden_dim, hidden_dim), jnp.float32) * 0.2
    b2 = jax.random.normal(k[4], (1, hidden_dim), jnp.float32) * 0.1
    w3 = jax.random.normal(k[5], (hidden_dim, action_dim), jnp.float32) * 0.2
    b3 = jax.random.normal(k[6], (1, action_dim), jnp.float32) * 0.1

    # Input: batch of discrete state indices, shape (B, 1), like torch LongTensor
    idx = jax.random.randint(k[7], (B, 1), 0, max_states, dtype=jnp.int32)

    out = critic_forward(idx, emb, w1, b1, w2, b2, w3, b3)
    out = jax.block_until_ready(out)

    ref = _ref_forward(idx, emb, w1, b1, w2, b2, w3, b3)
    assert out.shape == (B, action_dim)
    assert jnp.allclose(out, ref, atol=1e-3, rtol=1e-3)

    print("KERNEL_OK")
</pallas_src>

<mosaic_0001>
module attributes {stable_mosaic.version = 11 : i64} {
  func.func @critic_kernel(%arg0: i32, %arg1: memref<8x1xi32, #tpu.memory_space<vmem>>, %arg2: memref<128x128xf32, #tpu.memory_space<vmem>>, %arg3: memref<8x128xf32, #tpu.memory_space<vmem>>) attributes {dimension_semantics = [#tpu.dimension_semantics<parallel>], iteration_bounds = array<i64: 1>, scalar_prefetch = 0 : i64, scratch_operands = 0 : i64, tpu.core_type = #tpu.core_type<tc>, window_params = [{transform_indices = @transform_0, window_bounds = array<i64: 8, 1>}, {pipeline_mode = #tpu.pipeline_mode<synchronous>, transform_indices = @transform_1, window_bounds = array<i64: 128, 128>}, {transform_indices = @transform_2, window_bounds = array<i64: 8, 128>}]} {
    %c0 = arith.constant 0 : index
    %c0_0 = arith.constant 0 : index
    %0 = vector.load %arg1[%c0, %c0_0] : memref<8x1xi32, #tpu.memory_space<vmem>>, vector<8x1xi32>
    %1 = tpu.iota {dimensions = array<i32: 1>} : vector<8x128xi32>
    %2 = vector.broadcast %0 : vector<8x1xi32> to vector<8x128xi32>
    %3 = arith.cmpi eq, %1, %2 : vector<8x128xi32>
    %4 = arith.extui %3 : vector<8x128xi1> to vector<8x128xi32>
    %5 = arith.sitofp %4 : vector<8x128xi32> to vector<8x128xf32>
    %c0_1 = arith.constant 0 : index
    %c0_2 = arith.constant 0 : index
    %6 = vector.load %arg2[%c0_1, %c0_2] : memref<128x128xf32, #tpu.memory_space<vmem>>, vector<128x128xf32>
    %cst = arith.constant dense<0.000000e+00> : vector<8x128xf32>
    %7 = tpu.matmul %5, %6, %cst {dimension_numbers = #tpu.dot_dimension_numbers<[1], [0], [0], [1], [0, 0, 1, 1], [], []>} : vector<8x128xf32>, vector<128x128xf32>, vector<8x128xf32> -> vector<8x128xf32>
    %c0_3 = arith.constant 0 : index
    %c0_4 = arith.constant 0 : index
    %8 = vector.load %arg3[%c0_3, %c0_4] : memref<8x128xf32, #tpu.memory_space<vmem>>, vector<8x128xf32>
    tpu.vector_store %arg3[%c0_3, %c0_4], %7 {strides = array<i32>} : memref<8x128xf32, #tpu.memory_space<vmem>>, vector<8x128xf32>,
    return
  }
  func.func @transform_0(%arg0: i32) -> (i32, i32) {
    %c0_i32 = arith.constant 0 : i32
    %c0_i32_0 = arith.constant 0 : i32
    return %arg0, %c0_i32 : i32, i32
  }
  func.func @transform_1(%arg0: i32) -> (i32, i32) {
    %c0_i32 = arith.constant 0 : i32
    %c0_i32_0 = arith.constant 0 : i32
    %c0_i32_1 = arith.constant 0 : i32
    return %c0_i32, %c0_i32_0 : i32, i32
  }
  func.func @transform_2(%arg0: i32) -> (i32, i32) {
    %c0_i32 = arith.constant 0 : i32
    %c0_i32_0 = arith.constant 0 : i32
    return %arg0, %c0_i32 : i32, i32
  }
}

</mosaic_0001>

<bundles_post_ra>
// kernel: tpu_custom_call.1
= control target key start
LH: loop header
LB: loop body
LE: loop exit
PB: predicated region body
PF: predicated region fallthrough
CT: control target
= control target key end

     0   :  { %7 = vsyncpa [#allocation3], 0  ;;  %s324_s0 = inlined_call_operand.vmem [shape: s32[8,1], index: 0, kind: input, shape index: {}]   ;;  %s325_s1 = inlined_call_operand.hbm [shape: f32[128,128], index: 1, kind: input, shape index: {}]   ;;  %s326_s2 = inlined_call_operand.hbm [shape: f32[8,128], index: 2, kind: output, shape index: {}]  }
   0x1   :  { %8 = vsyncpa [#allocation4], 0  ;;  %s273_s9 = smov [#allocation2]   ;;  %s225_s13 = scalar_lea.hbm %s325_s1, 2048 }
   0x2   :  { %s16_s10 = sshll.u32 %s273_s9, 4  ;;  %p226_p0 = scmp.ne.s32.totalorder %s325_s1, %s225_s13  ;;  %s17_s10 = int_to_ptr.vmem [resolvable:$true] %s16_s10 }
   0x3   :  { %p229_p1 = scmp.lt.u32.totalorder %s225_s13, %s325_s1 }
   0x5   :  { %p231_p2 = pnand %p229_p1, %p226_p0 }
   0x7   :  { %234 = shalt.err (!%p231_p2)
}
   0x8   :  { %s235_s18 = scalar_lea.vmem %s17_s10, 2048  ;;  %p240_p4 = scmp.lt.s32.totalorder %s17_s10, %s17_s10 }
   0x9   :  { %p236_p3 = scmp.ne.s32.totalorder %s17_s10, %s235_s18  ;;  %p241_p5 = scmp.lt.s32.totalorder %s235_s18, %s235_s18 }
   0xb   :  { %p242_p6 = por %p241_p5, %p240_p4 }
   0xd   :  { %p243_p7 = pnand %p242_p6, %p236_p3 }
   0xf   :  { %246 = shalt.err (!%p243_p7)
}
  0x10   :  { %s274_s19 = smov 128   ;;  %s275_s20 = smov 8  }
  0x11   :  { %22 = dma.hbm_to_vmem [thread:$0]  %s325_s1, 2048, %s17_s10, [#allocation3], %s274_s19, %s274_s19, %s275_s20  }
  0x12   :  { %269 = dma.done.wait [#allocation3], 2048  }
  0x13   :  { %270 = vsyncadd [#allocation3], 4294965248  ;;  %v276_v0 = vmov 0   ;;  %v277_v1 = vmov 0.0|0.0   ;;  %v26_v2 = vld [vmem:[%s324_s0] sm:$0xff]  ;;  %v36_v4 = vld [vmem:[#allocation2 + $0x8] sm:$0xff]  ;;  %v27_v28 = vlaneseq }
  0x14   :  { %224 = vset.pattern.permute.xlu0 %v276_v0  ;;  %191 = vmatprep.subr.bf16.mxu0 %v277_v1  ;;  %v35_v3 = vld [vmem:[#allocation2] sm:$0xff]  ;;  %v37_v6 = vld [vmem:[#allocation2 + $0x10] sm:$0xff]  ;;  %v38_v7 = vld [vmem:[#allocation2 + $0x18] sm:$0xff]  ;;  %vm278_vm0 = vmmov 0   ;;  %v279_v8 = vmov 0.0   ;;  %v280_v31 = vmov 1.0  }
  0x15   :  { %30 = vperm.xlu0 %224, %v26_v2   ;;  %v192_v5 = vpack.c.bf16 %v36_v4, %v35_v3  ;;  %188 = vmatprep.mubr.msk.f32.mxu0 %vm278_vm0, %v279_v8  ;;  %v195_v9 = vpack.c.bf16 %v38_v7, %v37_v6  ;;  %v39_v10 = vld [vmem:[#allocation2 + $0x20] sm:$0xff]  ;;  %v40_v11 = vld [vmem:[#allocation2 + $0x28] sm:$0xff]  ;;  %v41_v13 = vld [vmem:[#allocation2 + $0x30] sm:$0xff]  ;;  %v28_v29 = vand.u32 127, %v27_v28  ;;  %s281_s0 = smov [#allocation5]  }
  0x16   :  { %v198_v12 = vpack.c.bf16 %v40_v11, %v39_v10  ;;  %v42_v14 = vld [vmem:[#allocation2 + $0x38] sm:$0xff]  ;;  %v43_v16 = vld [vmem:[#allocation2 + $0x40] sm:$0xff]  ;;  %v44_v17 = vld [vmem:[#allocation2 + $0x48] sm:$0xff]  ;;  %s128_s1 = sshll.u32 %s281_s0, 4  ;;  %s129_s1 = int_to_ptr.vmem [resolvable:$true] %s128_s1 }
  0x17   :  { %193 = vmatpush3.bf16.msra.mxu0 %v192_v5  ;;  %v201_v15 = vpack.c.bf16 %v42_v14, %v41_v13  ;;  %v204_v18 = vpack.c.bf16 %v44_v17, %v43_v16  ;;  %v45_v19 = vld [vmem:[#allocation2 + $0x50] sm:$0xff]  ;;  %v46_v20 = vld [vmem:[#allocation2 + $0x58] sm:$0xff]  ;;  %v47_v22 = vld [vmem:[#allocation2 + $0x60] sm:$0xff]  ;;  %s247_s25 = scalar_lea.vmem %s129_s1, 128  ;;  %p252_p9 = scmp.lt.s32.totalorder %s129_s1, %s129_s1 }
  0x18   :  { %194 = vmatprep.subr.bf16.mxu0 %v277_v1  ;;  %v207_v21 = vpack.c.bf16 %v46_v20, %v45_v19  ;;  %v48_v23 = vld [vmem:[#allocation2 + $0x68] sm:$0xff]  ;;  %v49_v25 = vld [vmem:[#allocation2 + $0x70] sm:$0xff]  ;;  %v50_v26 = vld [vmem:[#allocation2 + $0x78] sm:$0xff]  ;;  %p248_p8 = scmp.ne.s32.totalorder %s129_s1, %s247_s25  ;;  %p253_p10 = scmp.lt.s32.totalorder %s247_s25, %s247_s25 }
  0x19   :  { %v210_v24 = vpack.c.bf16 %v48_v23, %v47_v22  ;;  %v213_v27 = vpack.c.bf16 %v50_v26, %v49_v25 }
  0x1a   :  { %p254_p11 = por %p253_p10, %p252_p9 }
  0x1b   :  { %196 = vmatpush3.bf16.msra.mxu0 %v195_v9 }
  0x1c   :  { %197 = vmatprep.subr.bf16.mxu0 %v277_v1  ;;  %p255_p12 = pnand %p254_p11, %p248_p8 }
  0x1f   :  { %199 = vmatpush3.bf16.msra.mxu0 %v198_v12 }
  0x20   :  { %200 = vmatprep.subr.bf16.mxu0 %v277_v1 }
  0x23   :  { %202 = vmatpush3.bf16.msra.mxu0 %v201_v15 }
  0x24   :  { %203 = vmatprep.subr.bf16.mxu0 %v277_v1 }
  0x27   :  { %205 = vmatpush3.bf16.msra.mxu0 %v204_v18 }
  0x28   :  { %206 = vmatprep.subr.bf16.mxu0 %v277_v1 }
  0x2b   :  { %208 = vmatpush3.bf16.msra.mxu0 %v207_v21 }
  0x2c   :  { %209 = vmatprep.subr.bf16.mxu0 %v277_v1 }
  0x2f   :  { %211 = vmatpush3.bf16.msra.mxu0 %v210_v24 }
  0x30   :  { %212 = vmatprep.subr.bf16.mxu0 %v277_v1 }
  0x33   :  { %214 = vmatpush3.bf16.msra.mxu0 %v213_v27 }
  0x94   :  { %v31_v30 = vpop.permute.xlu0 %30 }
  0x95   :  { %vm32_vm1 = vcmp.eq.s32.totalorder %v28_v29, %v31_v30 }
  0x96   :  { %189 = vmatmul.mubr.msk.f32.vlgmr.msra.gmra.mrb[0].mxu0 %vm32_vm1, %v280_v31 }
 0x169   :  { %v117_v32 = vpop.f32.mrb[0].mxu0 }
 0x16a   :  { %121 = vst [vmem:[#allocation5] sm:$0xff] %v117_v32  ;;  %v190_v33 = vpop.f32.mrb[1].mxu0 }
 0x16b   :  { %258 = shalt.err (!%p255_p12)
}
 0x16c   :  { %s259_s28 = scalar_lea.hbm %s326_s2, 128 }
 0x16d   :  { %p260_p13 = scmp.ne.s32.totalorder %s326_s2, %s259_s28  ;;  %p263_p0 = scmp.lt.u32.totalorder %s259_s28, %s326_s2 }
 0x16f   :  { %p265_p1 = pnand %p263_p0, %p260_p13 }
 0x171   :  { %268 = shalt.err (!%p265_p1)
}
 0x172   :  { %131 = dma.vmem_to_hbm [thread:$0]  %s129_s1, 128, %s326_s2, [#allocation4]  }
 0x173   :  { %271 = dma.done.wait [#allocation4], 128  }
 0x174   :  { %272 = vsyncadd [#allocation4], 4294967168 }
 0x175   :  { %135 = vsyncpa [#allocation3], 1 }
 0x176   :  { %136 = vsyncpa [#allocation4], 1 }

</bundles_post_ra>
